<compile_context>
chip_gen: v7x
topology: tpu7x:2x2x1
jax: 0.10.0
libtpu: 0.0.40
codegen_flags: <defaults>
</compile_context>

<pallas_src>
import functools

import jax
import jax.numpy as jnp
import numpy as np
from jax.experimental import pallas as pl
from jax.experimental.pallas import tpu as pltpu


def _graph_attention_kernel(c_ref, g_ref, a_ref, o_ref, *, nsample, alpha):
    t, Kc = c_ref.shape          # (tile, C+D)
    D = o_ref.shape[-1]
    ns = nsample

    c = c_ref[...]               # (t, Kc)        bf16
    g = g_ref[...]               # (t*ns, Kc)     bf16
    a = a_ref[...]               # (Kc, D)        bf16

    # One fused matmul each (K = C + D <= 128 -> one MXU K-push), f32 accum.
    # The subtraction distributes over the matmul:
    #   cat(center - grouped) @ a == (c_cat @ a)[:, None, :] - (g_cat @ a)
    c_proj = jnp.dot(c, a, preferred_element_type=jnp.float32)          # (t, D)
    g_proj = jnp.dot(g, a, preferred_element_type=jnp.float32)          # (t*ns, D)
    g_proj = g_proj.reshape(t, ns, D)

    e = c_proj[:, None, :] - g_proj                                     # (t, ns, D)
    e = jnp.where(e >= 0, e, alpha * e)          # LeakyReLU(negative_slope=alpha)

    # Softmax over nsample, normalization deferred past the pooling sum
    # (denom >= 1 after max-subtraction, so the approx reciprocal is safe).
    e_max = jnp.max(e, axis=1, keepdims=True)                           # (t, 1, D)
    p = jnp.exp(e - e_max)                                              # (t, ns, D)

    # Feature channels sit at lanes [0, D) of the concatenated grouped input.
    gf = g[:, :D].astype(jnp.float32).reshape(t, ns, D)

    # TODO(synk): combine the two ns-reductions (lane-stack p*gf | p) and pack
    # 4 samples' channels into full 128-lane rows for the attention math;
    # skipped here to keep Mosaic lowering on the well-trodden path.
    wsum = jnp.sum(p * gf, axis=1)                                      # (t, D)
    denom = jnp.sum(p, axis=1)                                          # (t, D)

    # TODO(synk): F.dropout on the attention weights is identity in eval mode;
    # training-mode dropout is not implemented.
    o_ref[...] = (wsum * pl.reciprocal(denom, approx=True)).astype(o_ref.dtype)


def _vmem_budget():
    """Returns (vmem_limit_bytes, max_tile_rows) tuned per TPU generation."""
    try:
        cap = pltpu.get_tpu_info().vmem_capacity_bytes
    except Exception:
        cap = None
    if cap is not None and cap >= 100 * 1024 * 1024:
        # v5e / v6e: 128 MiB physical VMEM -> bigger tiles, fewer grid steps.
        return 64 * 1024 * 1024, 1024
    if cap is not None:
        # v7x: 64 MiB per TensorCore -> stay well under it.
        return 32 * 1024 * 1024, 512
    # Unknown chip: conservative (also covers v5e's 16 MiB scoped default).
    return 32 * 1024 * 1024, 512


def _choose_tile(n_points, nsample, vmem_limit_bytes, max_rows):
    """Largest 8-aligned point tile that fits the VMEM budget, with >= 2
    (preferably an even number of) grid steps so pipelining and the v7x
    megacore split both have work."""
    lane = 128
    per_point = (
        2 * (nsample * lane * 2 + lane * 2)   # double-buffered bf16 inputs
        + 2 * lane * 4                        # double-buffered f32 output
        + 6 * nsample * lane * 4              # f32 (ns, D)-shaped temporaries
        + 8 * lane * 4                        # f32 (D,)-shaped temporaries
    )
    budget = (vmem_limit_bytes * 3) // 4
    cap = max(8, budget // per_point)
    cap = min(cap, max_rows)
    if n_points > 8:
        half = ((-(-n_points // 2)) + 7) // 8 * 8   # ceil(N/2), rounded up to 8
        cap = min(cap, half)                        # guarantees >= 2 grid steps
    tile = max(8, (cap // 8) * 8)
    steps = -(-n_points // tile)
    if steps > 1 and steps % 2 == 1:
        # Prefer an even step count (balanced across v7x's two TensorCores).
        alt = -(-n_points // (steps + 1))
        alt = max(8, ((alt + 7) // 8) * 8)
        if (-(-n_points // alt)) % 2 == 0:
            tile = alt
    return tile


def graph_attention(center_xyz, center_feature, grouped_xyz, grouped_feature, a,
                    *, alpha=0.2, tile_np=None, vmem_limit_bytes=None,
                    grouped_buffering=None, compute_dtype=jnp.bfloat16):
    B, npoint, C = center_xyz.shape
    _, _, nsample, D = grouped_feature.shape
    assert a.shape == (C + D, D)
    Kc = C + D
    N = B * npoint

    default_limit, max_rows = _vmem_budget()
    if vmem_limit_bytes is None:
        vmem_limit_bytes = default_limit

    # Fuse the channel concat into a single K = C+D matmul. Feature channels
    # first so the in-kernel pooling slice starts at lane 0; the weight rows
    # are permuted to match. The bf16 cast is fused into these copies.
    c_cat = jnp.concatenate([center_feature, center_xyz], axis=-1)
    c_cat = c_cat.reshape(N, Kc).astype(compute_dtype)
    g_cat = jnp.concatenate([grouped_feature, grouped_xyz], axis=-1)
    g_cat = g_cat.reshape(N, nsample, Kc).astype(compute_dtype)
    a_r = jnp.concatenate([a[C:, :], a[:C, :]], axis=0).astype(compute_dtype)

    if tile_np is None:
        tile_np = _choose_tile(N, nsample, vmem_limit_bytes, max_rows)
    tile_np = max(8, (tile_np // 8) * 8)

    # Pad N up to a multiple of the tile (padded rows produce finite garbage
    # that is sliced off below) instead of requiring an exact divisor.
    steps = -(-N // tile_np)
    n_pad = steps * tile_np
    if n_pad != N:
        pad = n_pad - N
        c_cat = jnp.pad(c_cat, ((0, pad), (0, 0)))
        g_cat = jnp.pad(g_cat, ((0, pad), (0, 0), (0, 0)))
    # Flatten grouped to 2-D so the kernel's matmul needs no in-kernel
    # sublane relayout (ns is folded into the row axis, last dim unchanged).
    g2d = g_cat.reshape(n_pad * nsample, Kc)

    kernel = functools.partial(_graph_attention_kernel,
                               nsample=nsample, alpha=float(alpha))

    g_spec_kwargs = {}
    if grouped_buffering is not None:
        # v5e (lowest HBM bandwidth): deepen buffering on the dominant input
        # if xprof shows exposed DMA.
        g_spec_kwargs["pipeline_mode"] = pl.Buffered(grouped_buffering)
    g_spec = pl.BlockSpec((tile_np * nsample, Kc), lambda i: (i, 0),
                          **g_spec_kwargs)

    out = pl.pallas_call(
        kernel,
        out_shape=jax.ShapeDtypeStruct((n_pad, D), center_feature.dtype),
        grid_spec=pltpu.PrefetchScalarGridSpec(
            num_scalar_prefetch=0,
            grid=(steps,),
            in_specs=[
                pl.BlockSpec((tile_np, Kc), lambda i: (i, 0)),
                g_spec,
                pl.BlockSpec((Kc, D), lambda i: (0, 0)),
            ],
            out_specs=pl.BlockSpec((tile_np, D), lambda i: (i, 0)),
        ),
        compiler_params=pltpu.CompilerParams(
            dimension_semantics=("parallel",),
            vmem_limit_bytes=vmem_limit_bytes,
        ),
    )(c_cat, g2d, a_r)

    return out[:N].reshape(B, npoint, D)


def graph_attention_ref(center_xyz, center_feature, grouped_xyz, grouped_feature,
                        a, alpha):
    """Pure-JAX reference mirroring the PyTorch forward (eval mode)."""
    delta_p = center_xyz[:, :, None, :] - grouped_xyz
    delta_h = center_feature[:, :, None, :] - grouped_feature
    cat = jnp.concatenate([delta_p, delta_h], axis=-1)
    e = cat @ a
    e = jnp.where(e >= 0, e, alpha * e)
    attn = jax.nn.softmax(e, axis=2)
    return jnp.sum(attn * grouped_feature, axis=2)


if __name__ == "__main__":
    B, npoint, nsample, C, D = 2, 16, 8, 4, 32
    all_channel, feature_dim = C + D, D
    alpha = 0.2    # LeakyReLU negative slope
    dropout = 0.0  # inference: dropout is identity

    key = jax.random.PRNGKey(0)
    k1, k2, k3, k4, k5 = jax.random.split(key, 5)

    center_xyz = jax.random.normal(k1, (B, npoint, C), dtype=jnp.float32)
    center_feature = jax.random.normal(k2, (B, npoint, D), dtype=jnp.float32)
    grouped_xyz = jax.random.normal(k3, (B, npoint, nsample, C), dtype=jnp.float32)
    grouped_feature = jax.random.normal(k4, (B, npoint, nsample, D), dtype=jnp.float32)

    # xavier_uniform_ with gain=1.414 on a [all_channel, feature_dim] parameter
    gain = 1.414
    bound = gain * float(np.sqrt(6.0 / (all_channel + feature_dim)))
    a_param = jax.random.uniform(
        k5, (all_channel, feature_dim), minval=-bound, maxval=bound,
        dtype=jnp.float32)

    out = graph_attention(center_xyz, center_feature, grouped_xyz,
                          grouped_feature, a_param, alpha=alpha)
    out = jax.block_until_ready(out)

    ref = graph_attention_ref(center_xyz, center_feature, grouped_xyz,
                              grouped_feature, a_param, alpha)

    # bf16 matmul operands (f32 accumulation), the re-associated projection
    # and the approximate EUP reciprocal give ~1e-2-level deviations; any
    # algorithmic bug would produce errors orders of magnitude larger.
    np.testing.assert_allclose(np.asarray(out), np.asarray(ref),
                               rtol=3e-2, atol=3e-2)

    print("KERNEL_OK")
</pallas_src>

<mosaic_0001>
module attributes {stable_mosaic.version = 11 : i64} {
  func.func @_graph_attention_kernel(%arg0: i32, %arg1: memref<16x36xbf16, #tpu.memory_space<vmem>>, %arg2: memref<128x36xbf16, #tpu.memory_space<vmem>>, %arg3: memref<36x32xbf16, #tpu.memory_space<vmem>>, %arg4: memref<16x32xf32, #tpu.memory_space<vmem>>) attributes {dimension_semantics = [#tpu.dimension_semantics<parallel>], iteration_bounds = array<i64: 2>, scalar_prefetch = 0 : i64, scratch_operands = 0 : i64, tpu.core_type = #tpu.core_type<tc>, window_params = [{transform_indices = @transform_0, window_bounds = array<i64: 16, 36>}, {transform_indices = @transform_1, window_bounds = array<i64: 128, 36>}, {pipeline_mode = #tpu.pipeline_mode<synchronous>, transform_indices = @transform_2, window_bounds = array<i64: 36, 32>}, {transform_indices = @transform_3, window_bounds = array<i64: 16, 32>}]} {
    %c0 = arith.constant 0 : index
    %c0_0 = arith.constant 0 : index
    %0 = vector.load %arg1[%c0, %c0_0] : memref<16x36xbf16, #tpu.memory_space<vmem>>, vector<16x36xbf16>
    %c0_1 = arith.constant 0 : index
    %c0_2 = arith.constant 0 : index
    %1 = vector.load %arg2[%c0_1, %c0_2] : memref<128x36xbf16, #tpu.memory_space<vmem>>, vector<128x36xbf16>
    %c0_3 = arith.constant 0 : index
    %c0_4 = arith.constant 0 : index
    %2 = vector.load %arg3[%c0_3, %c0_4] : memref<36x32xbf16, #tpu.memory_space<vmem>>, vector<36x32xbf16>
    %cst = arith.constant dense<0.000000e+00> : vector<16x32xf32>
    %3 = tpu.matmul %0, %2, %cst {dimension_numbers = #tpu.dot_dimension_numbers<[1], [0], [0], [1], [0, 0, 1, 1], [], []>} : vector<16x36xbf16>, vector<36x32xbf16>, vector<16x32xf32> -> vector<16x32xf32>
    %cst_5 = arith.constant dense<0.000000e+00> : vector<128x32xf32>
    %4 = tpu.matmul %1, %2, %cst_5 {dimension_numbers = #tpu.dot_dimension_numbers<[1], [0], [0], [1], [0, 0, 1, 1], [], []>} : vector<128x36xbf16>, vector<36x32xbf16>, vector<128x32xf32> -> vector<128x32xf32>
    %5 = vector.shape_cast %4 : vector<128x32xf32> to vector<16x8x32xf32>
    %6 = vector.shape_cast %3 : vector<16x32xf32> to vector<16x1x32xf32>
    %7 = vector.broadcast %6 : vector<16x1x32xf32> to vector<16x8x32xf32>
    %8 = arith.subf %7, %5 : vector<16x8x32xf32>
    %cst_6 = arith.constant 0.000000e+00 : f32
    %9 = vector.broadcast %cst_6 : f32 to vector<16x8x32xf32>
    %10 = arith.cmpf oge, %8, %9 : vector<16x8x32xf32>
    %cst_7 = arith.constant 2.000000e-01 : f32
    %11 = vector.broadcast %cst_7 : f32 to vector<16x8x32xf32>
    %12 = arith.mulf %11, %8 : vector<16x8x32xf32>
    %13 = arith.select %10, %8, %12 : vector<16x8x32xi1>, vector<16x8x32xf32>
    %cst_8 = arith.constant dense<0xFF800000> : vector<16x32xf32>
    %14 = vector.multi_reduction <maximumf>, %13, %cst_8 [1] : vector<16x8x32xf32> to vector<16x32xf32>
    %15 = vector.shape_cast %14 : vector<16x32xf32> to vector<16x1x32xf32>
    %16 = vector.broadcast %15 : vector<16x1x32xf32> to vector<16x8x32xf32>
    %17 = arith.subf %13, %16 : vector<16x8x32xf32>
    %18 = math.exp %17 : vector<16x8x32xf32>
    %19 = vector.extract_strided_slice %1 {offsets = [0, 0], sizes = [128, 32], strides = [1, 1]} : vector<128x36xbf16> to vector<128x32xbf16>
    %20 = arith.extf %19 : vector<128x32xbf16> to vector<128x32xf32>
    %21 = vector.shape_cast %20 : vector<128x32xf32> to vector<16x8x32xf32>
    %22 = arith.mulf %18, %21 : vector<16x8x32xf32>
    %cst_9 = arith.constant dense<0.000000e+00> : vector<16x32xf32>
    %23 = vector.multi_reduction <add>, %22, %cst_9 [1] : vector<16x8x32xf32> to vector<16x32xf32>
    %cst_10 = arith.constant dense<0.000000e+00> : vector<16x32xf32>
    %24 = vector.multi_reduction <add>, %18, %cst_10 [1] : vector<16x8x32xf32> to vector<16x32xf32>
    %25 = tpu.reciprocal %24 {approx = true} : vector<16x32xf32> -> vector<16x32xf32>
    %26 = arith.mulf %23, %25 : vector<16x32xf32>
    %c0_11 = arith.constant 0 : index
    %c0_12 = arith.constant 0 : index
    %27 = vector.load %arg4[%c0_11, %c0_12] : memref<16x32xf32, #tpu.memory_space<vmem>>, vector<16x32xf32>
    tpu.vector_store %arg4[%c0_11, %c0_12], %26 {strides = array<i32>} : memref<16x32xf32, #tpu.memory_space<vmem>>, vector<16x32xf32>,
    return
  }
  func.func @transform_0(%arg0: i32) -> (i32, i32) {
    %c0_i32 = arith.constant 0 : i32
    %c0_i32_0 = arith.constant 0 : i32
    return %arg0, %c0_i32 : i32, i32
  }
  func.func @transform_1(%arg0: i32) -> (i32, i32) {
    %c0_i32 = arith.constant 0 : i32
    %c0_i32_0 = arith.constant 0 : i32
    return %arg0, %c0_i32 : i32, i32
  }
  func.func @transform_2(%arg0: i32) -> (i32, i32) {
    %c0_i32 = arith.constant 0 : i32
    %c0_i32_0 = arith.constant 0 : i32
    %c0_i32_1 = arith.constant 0 : i32
    return %c0_i32, %c0_i32_0 : i32, i32
  }
  func.func @transform_3(%arg0: i32) -> (i32, i32) {
    %c0_i32 = arith.constant 0 : i32
    %c0_i32_0 = arith.constant 0 : i32
    return %arg0, %c0_i32 : i32, i32
  }
}

</mosaic_0001>

<bundles_post_ra>
// kernel: tpu_custom_call.1
= control target key start
LH: loop header
LB: loop body
LE: loop exit
PB: predicated region body
PF: predicated region fallthrough
CT: control target
= control target key end

     0   :  { %8 = vsyncpa [#allocation3], 0  ;;  %s2097_s0 = inlined_call_operand.vmem [shape: bf16[32,36], index: 0, kind: input, shape index: {}]   ;;  %s2098_s1 = inlined_call_operand.vmem [shape: bf16[256,36], index: 1, kind: input, shape index: {}]   ;;  %s2099_s2 = inlined_call_operand.vmem [shape: bf16[36,32], index: 2, kind: input, shape index: {}]   ;;  %s2100_s3 = inlined_call_operand.hbm [shape: f32[32,32], index: 3, kind: output, shape index: {}]  }
   0x1   :  { %10 = vsyncpa [#allocation3 + $0x1], 0  ;;  %s1581_s12 = smov 0   ;;  %s1583_s13 = smov 0  }
   0x2   :  { %s1585_s14 = smov 0   ;;  %s1587_s15 = smov 0  }
   0x3 LB: > { %s1602_s16 = sadd.s32 4294967295, %s1553_s15   ;;  %s1270_s17 = sadd.s32 4294967294, %s1553_s15   ;;  %s1553_s15 = sphi %s1587_s15, %s2114_s15   ;;  %s1549_s14 = sphi %s1585_s14, %s2113_s14   ;;  %s1545_s13 = sphi %s1583_s13, %s2112_s13   ;;  %s1541_s12 = sphi %s1581_s12, %s2111_s12  }
   0x4   : > { %s1606_s18 = sadd.s32 1, %s1553_s15   ;;  %s96_s19 = sadd.s32 1, %s1549_s14 }
   0x5   : > { %s93_s20 = ssub.s32 %s1553_s15, %s1606_s18  ;;  %p106_p0 = scmp.ne.s32.totalorder %s1549_s14, %s1545_s13 }
   0x6   : > { %p94_p1 = scmp.eq.s32.totalorder %s93_s20, 0  ;;  %p107_p2 = scmp.eq.s32.totalorder %s1602_s16, 1 }
   0x7   : > { %p112_p3 = scmp.ne.s32.totalorder %s1545_s13, %s1541_s12  ;;  %p113_p4 = scmp.eq.s32.totalorder %s1270_s17, 1 }
   0x8   : > { %s1617_s21 = scalar_select %p94_p1, %s1549_s14, %s96_s19  }
   0x9   : > { %p1619_p5 = por %p107_p2, %p106_p0  ;;  %p1623_p6 = por %p113_p4, %p112_p3 }
   0xa   : > { %p1273_p7 = scmp.ge.s32.totalorder %s1553_s15, 1  ;;  %p152_p8 = scmp.lt.s32.totalorder %s1553_s15, 3 }
   0xc   : > { %p153_p9 = pnand %p1273_p7, %p152_p8 }
   0xd   : > { %v1405_v0 = vld [vmem:[%s2099_s2] sm:$0xff] (!%p153_p9)   ;;  %v1555_v1 = vmov (!%p153_p9), 0.0   ;;  %v1406_v2 = vld [vmem:[%s2099_s2 + $0x8] sm:$0xff] (!%p153_p9)   ;;  %v1407_v3 = vld [vmem:[%s2099_s2 + $0x10] ss:$0 sps:$4 sm:$0x33] (!%p153_p9)   ;;  %v454_v16 = vlaneseq (!%p153_p9) }
   0xe   : > { %156 = sbr.rel (%p153_p9) target bundleno = 425 (0x1a9), region = 32  ;;  %1321 = vmatprep.subr.bf16.mxu0 (!%p153_p9), %v1555_v1  ;;  %1353 = vmatprep.subr.bf16.mxu1 (!%p153_p9), %v1405_v0  ;;  %s1275_s30 = sshll.u32 (!%p153_p9), %s1602_s16, 1  ;;  %vm242_vm0 = vcmask (!%p153_p9), 1041408   ;;  %vm1556_vm1 = vmmov (!%p153_p9), 0   ;;  %vm238_vm2 = vcmask (!%p153_p9), 293888   ;;  %vm692_vm3 = vcmask (!%p153_p9), 261120  }
   0xf   : > { %1322 = vmatpush3.bf16.msra.mxu0 (!%p153_p9), %v1405_v0  ;;  %1356 = vmatpush3.bf16.msra.mxu1 (!%p153_p9), %v1405_v0  ;;  %s1277_s4 = sshll.u32 (!%p153_p9), %s1602_s16, 4  ;;  %p182_p10 = scmp.lt.s32.totalorder (!%p153_p9), %s1275_s30, 3  ;;  %v244_v4 = vsel (!%p153_p9), %vm242_vm0, %v1407_v3, 0  ;;  %v1557_v14 = vmov (!%p153_p9), 1966171168   ;;  %v455_v18 = vshrl.u32 (!%p153_p9), %v454_v16, 7 }
  0x10   : > { %1323 = vmatprep.subr.bf16.mxu0 (!%p153_p9), %v1555_v1  ;;  %1354 = vmatprep.subr.bf16.mxu1 (!%p153_p9), %v1406_v2  ;;  %p188_p11 = scmp.lt.s32.totalorder (!%p153_p9), %s1277_s4, 31  ;;  %v452_v15 = vunpack.c.l.s4 (!%p153_p9), %v1557_v14  ;;  %s178_s19 = sand.u32 (!%p153_p9), 1, %s1545_s13  }
  0x11   : > { %1327 = vmatprep.mubr.msk.bf16.mxu0 (!%p153_p9), %vm1556_vm1, %v1555_v1  ;;  %v1702_v31 = vsub.s32 (!%p153_p9), 0, %v455_v18  ;;  %s1274_s20 = sshll.u32 (!%p153_p9), %s178_s19, 4  ;;  %s1305_s25 = sshll.u32 (!%p153_p9), %s1602_s16, 8 }
  0x12   : > { %v453_v17 = vunpack.c.0.s8 (!%p153_p9), %v452_v15  ;;  %s2032_s24 = scalar_lea.vmem (!%p153_p9), [#allocation2], %s1274_s20  ;;  %s2046_s29 = scalar_lea.hbm (!%p153_p9), %s2100_s3, %s1305_s25 }
  0x13   : > { %1324 = vmatpush3.bf16.msra.mxu0 (!%p153_p9), %v1406_v2  ;;  %1357 = vmatpush3.bf16.msra.mxu1 (!%p153_p9), %v1406_v2  ;;  %s1196_s26 = sshll.u32 (!%p153_p9), %s2032_s24, 4  ;;  %s2056_s16 = scalar_lea.sflag (!%p153_p9), [#allocation3], %s178_s19  ;;  %s2048_s26 = int_to_ptr.vmem [resolvable:$true] %s1196_s26 }
  0x14   : > { %1325 = vmatprep.subr.bf16.mxu0 (!%p153_p9), %v1555_v1  ;;  %1360 = vmatprep.subr.msk.bf16.mxu1 (!%p153_p9), %vm242_vm0, %v1407_v3  ;;  %v1692_v19 = vsub.s32 (!%p153_p9), %v453_v17, %v455_v18 }
  0x15   : > { %s2116_s30 = smov (!%p182_p10, %s1275_s30), 3  ;;  %s2118_s4 = smov (!%p188_p11, %s1277_s4), 31 }
  0x16   : > { %s1276_s5 = sshll.u32 %s2116_s30, 2  ;;  %s1278_s9 = sshll.u32 %s2118_s4, 2 }
  0x17   : > { %s185_s8 = scalar_lea.vmem %s2097_s0, %s1276_s5  ;;  %1326 = vmatpush3.bf16.msra.mxu0 %v244_v4  ;;  %s1648_s17 = scalar_lea.vmem %s2098_s1, %s1278_s9  ;;  %1358 = vmatpush3.bf16.msra.mxu1 %v244_v4 }
  0x18   : > { %v1408_v5 = vld [vmem:[%s185_s8] sm:$0xff]   ;;  %1331 = vmatprep.subr.bf16.mxu0 %v1405_v0  ;;  %v1651_v6 = vld [vmem:[%s1648_s17 + $0x10] sm:$0xff]   ;;  %v1654_v7 = vld [vmem:[%s1648_s17 + $0x18] sm:$0xff]   ;;  %s1491_s30 = scalar_lea.vmem %s2048_s26, 256  ;;  %s1558_s4 = smov [#allocation2]  }
  0x19   : > { %v1657_v8 = vld [vmem:[%s1648_s17 + $0x20] sm:$0xff]   ;;  %1341 = vmatprep.mubr.msk.bf16.mxu1 %vm238_vm2, %v1651_v6  ;;  %v1670_v10 = vld [vmem:[%s1648_s17 + $0x28] sm:$0xff]   ;;  %v1675_v11 = vld [vmem:[%s1648_s17 + $0x30] sm:$0xff]   ;;  %v857_v20 = vunpack.c.l.bf16 %v1651_v6  ;;  %v858_v21 = vunpack.c.h.bf16 %v1651_v6  ;;  %v859_v23 = vunpack.c.l.bf16 %v1654_v7  ;;  %p1492_p12 = scmp.ne.s32.totalorder %s2048_s26, %s1491_s30  ;;  %s1495_s5 = sshll.u32 %s1558_s4, 4  ;;  %s1496_s5 = int_to_ptr.vmem [resolvable:$false] %s1495_s5 }
  0x1a   : > { %v1660_v9 = vld [vmem:[%s1648_s17] sm:$0xff]   ;;  %1328 = vmatmul.mubr.msk.bf16.vlgmr.msra.gmra.mrb[0].mxu0 %vm238_vm2, %v1408_v5  ;;  %1342 = vmatmul.mubr.msk.bf16.vlgmr.msra.gmra.mrb[0].mxu1 %vm238_vm2, %v1654_v7  ;;  %v1678_v12 = vld [vmem:[%s1648_s17 + $0x8] sm:$0xff]   ;;  %v1686_v13 = vld [vmem:[%s1648_s17 + $0x38] sm:$0xff]   ;;  %v863_v30 = vunpack.c.l.bf16 %v1670_v10  ;;  %s1497_s6 = scalar_lea.vmem %s1496_s5, 512  ;;  %p1498_p1 = scmp.lt.s32.totalorder %s2048_s26, %s1496_s5 }
  0x1b   : > { %1332 = vmatpush3.bf16.msra.mxu0 %v1405_v0  ;;  %1345 = vmatprep.mubr.msk.bf16.mxu1 %vm238_vm2, %v1657_v8  ;;  %p1493_p13 = pnand %p1492_p12, %p1619_p5  ;;  %p1499_p2 = scmp.lt.s32.totalorder %s1497_s6, %s1491_s30 }
  0x1c   : > { %1333 = vmatprep.subr.bf16.mxu0 %v1406_v2  ;;  %1337 = vmatprep.mubr.msk.bf16.mxu0 %vm238_vm2, %v1660_v9 }
  0x1d   : > { %p1494_p0 = pneg %p1493_p13  ;;  %p1500_p3 = por %p1499_p2, %p1498_p1 }
  0x1f   : > { %1334 = vmatpush3.bf16.msra.mxu0 %v1406_v2  ;;  %p1501_p4 = pnand %p1500_p3, %p1494_p0 }
  0x20   : > { %1359 = vmatprep.subr.msk.bf16.mxu0 %vm242_vm0, %v1407_v3 }
  0x22   : > { %1346 = vmatmul.mubr.msk.bf16.gmra.mrb[4].mxu1 %vm238_vm2, %v1670_v10 }
  0x23   : > { %1336 = vmatpush3.bf16.msra.mxu0 %v244_v4  ;;  %1349 = vmatprep.mubr.msk.bf16.mxu1 %vm238_vm2, %v1675_v11 }
  0x26   : > { %1338 = vmatmul.mubr.msk.bf16.vlgmr.msra.gmra.mrb[4].mxu0 %vm238_vm2, %v1678_v12 }
  0x2a   : > { %1350 = vmatmul.mubr.msk.bf16.gmra.mrb[8].mxu1 %vm238_vm2, %v1686_v13 }
  0xed   : > { %v280_v22 = vpop.f32.mrb[0].mxu0  ;;  %v1343_v32 = vpop.f32.mrb[0].mxu1 }
  0xee   : > { %v450_v25 = vcombine.high %v280_v22, %v280_v22  ;;  %v457_v26 = vrot.slane %v280_v22, %v1692_v19  ;;  %v1329_v27 = vpop.f32.mrb[1].mxu0  ;;  %v401_v38 = vpop.f32.mrb[1].mxu1 }
  0xef   : > { %v283_v33 = vpop.f32.mrb[2].mxu0  ;;  %v1344_v44 = vpop.f32.mrb[2].mxu1 }
  0xf0   : > { %v464_v34 = vrot.slane %v450_v25, %v1692_v19  ;;  %v465_v35 = vcombine.high %v457_v26, %v457_v26  ;;  %v1706_v36 = vrot.slane %v457_v26, %v1692_v19  ;;  %v499_v37 = vcombine.high %v283_v33, %v283_v33  ;;  %v1330_v39 = vpop.f32.mrb[3].mxu0  ;;  %v404_v49 = vpop.f32.mrb[3].mxu1 }
  0xf1   : > { %v506_v43 = vrot.slane %v283_v33, %v1692_v19 }
  0xf2   : > { %v466_v45 = vcombine.high %v464_v34, %v464_v34  ;;  %v480_v46 = vrot.slane %v464_v34, %v1692_v19  ;;  %v1714_v47 = vrot.slane %v465_v35, %v1692_v19  ;;  %v1717_v48 = vrot.slane %v499_v37, %v1692_v19 }
  0xf3   : > { %v514_v50 = vcombine.high %v506_v43, %v506_v43  ;;  %v522_v51 = vrot.slane %v506_v43, %v1692_v19  ;;  %v495_v52 = vcombine.high %v1706_v36, %v1706_v36  ;;  %v551_v56 = vrot.slane %v1706_v36, %v1702_v31 }
  0xf4   : > { %v496_v53 = vcombine.high %v480_v46, %v480_v46  ;;  %v1724_v54 = vrot.slane %v1717_v48, %v1692_v19  ;;  %v567_v55 = vrot.slane %v480_v46, %v1702_v31  ;;  %v494_v58 = vrot.slane %v466_v45, %v1692_v19 }
  0xf5   : > { %v1730_v57 = vrot.slane %v514_v50, %v1692_v19  ;;  %v544_v59 = vcombine.high %v522_v51, %v522_v51  ;;  %v583_v60 = vrot.slane %v522_v51, %v1702_v31  ;;  %v559_v63 = vrot.slane %v495_v52, %v1702_v31  ;;  %v1347_v3 = vpop.f32.mrb[4].mxu1 }
  0xf6   : > { %v575_v61 = vrot.slane %v496_v53, %v1702_v31  ;;  %v632_v62 = vsub.f32 %v567_v55, %v401_v38  ;;  %v497_v0 = vcombine.high %v1714_v47, %v1714_v47  ;;  %v498_v1 = vcombine.high %v494_v58, %v494_v58  ;;  %v417_v16 = vpop.f32.mrb[5].mxu1 }
  0xf7   : > { %v571_v2 = vrot.slane %v494_v58, %v1702_v31  ;;  %v591_v4 = vrot.slane %v544_v59, %v1702_v31  ;;  %v546_v5 = vcombine.high %v1730_v57, %v1730_v57  ;;  %v587_v17 = vrot.slane %v1730_v57, %v1702_v31  ;;  %v1348_v27 = vpop.f32.mrb[6].mxu1 }
  0xf8   : > { %v634_v14 = vsub.f32 %v575_v61, %v1343_v32  ;;  %vm648_vm4 = vcmp.ge.f32.partialorder %v632_v62, 0.0  ;;  %v664_v15 = vmul.f32 0.2, %v632_v62  ;;  %v579_v18 = vrot.slane %v498_v1, %v1702_v31  ;;  %v1748_v32 = vpop.f32.mrb[7].mxu1 }
  0xf9   : > { %v633_v22 = vsub.f32 %v571_v2, %v404_v49  ;;  %v638_v25 = vsub.f32 %v591_v4, %v1347_v3  ;;  %v636_v26 = vsub.f32 %v583_v60, %v417_v16  ;;  %v1339_v33 = vpop.f32.mrb[4].mxu0  ;;  %v595_v37 = vrot.slane %v546_v5, %v1702_v31 }
  0xfa   : > { %vm650_vm5 = vcmp.ge.f32.partialorder %v634_v14, 0.0  ;;  %v666_v34 = vmul.f32 0.2, %v634_v14  ;;  %v1745_v35 = vsel %vm648_vm4, %v632_v62, %v664_v15  ;;  %v1750_v38 = vpop.f32.mrb[5].mxu0  ;;  %v635_v43 = vsub.f32 %v579_v18, %v1344_v44 }
  0xfb   : > { %v721_v39 = vsel %vm692_vm3, %v1745_v35, -inf  ;;  %vm649_vm6 = vcmp.ge.f32.partialorder %v633_v22, 0.0  ;;  %v665_v45 = vmul.f32 0.2, %v633_v22  ;;  %v1754_v46 = vpop.f32.mrb[6].mxu0  ;;  %vm654_vm7 = vcmp.ge.f32.partialorder %v638_v25, 0.0 }
  0xfc   : > { %v1756_v49 = vsel %vm650_vm5, %v634_v14, %v666_v34  ;;  %v722_v50 = vrot.slane %v721_v39, 4  ;;  %v670_v51 = vmul.f32 0.2, %v638_v25  ;;  %v1758_v52 = vpop.f32.mrb[7].mxu0  ;;  %vm651_vm8 = vcmp.ge.f32.partialorder %v635_v43, 0.0 }
  0xfd   : > { %v735_v53 = vsel %vm692_vm3, %v1756_v49, -inf  ;;  %v667_v55 = vmul.f32 0.2, %v635_v43  ;;  %v1762_v58 = vsel %vm649_vm6, %v633_v22, %v665_v45  ;;  %vm652_vm9 = vcmp.ge.f32.partialorder %v636_v26, 0.0  ;;  %v1772_v3 = vpop.f32.mrb[8].mxu1 }
  0xfe   : > { %v736_v59 = vrot.slane %v735_v53, 4  ;;  %v723_v44 = vmax.f32 %v721_v39, %v722_v50  ;;  %v728_v60 = vsel %vm692_vm3, %v1762_v58, -inf  ;;  %v1766_v61 = vsel %vm654_vm7, %v638_v25, %v670_v51  ;;  %v1776_v16 = vpop.f32.mrb[9].mxu1 }
  0xff   : > { %v1768_v62 = vsel %vm651_vm8, %v635_v43, %v667_v55  ;;  %v729_v1 = vrot.slane %v728_v60, 4  ;;  %v763_v2 = vsel %vm692_vm3, %v1766_v61, -inf  ;;  %v668_v25 = vmul.f32 0.2, %v636_v26  ;;  %v1778_v39 = vpop.f32.mrb[10].mxu1 }
 0x100   : > { %v737_v4 = vmax.f32 %v735_v53, %v736_v59  ;;  %v724_v5 = vrot.slane %v723_v44, 2  ;;  %v742_v14 = vsel %vm692_vm3, %v1768_v62, -inf  ;;  %v764_v15 = vrot.slane %v763_v2, 4  ;;  %v1780_v55 = vpop.f32.mrb[11].mxu1 }
 0x101   : > { %v743_v18 = vrot.slane %v742_v14, 4  ;;  %v730_v22 = vmax.f32 %v728_v60, %v729_v1  ;;  %v639_v34 = vsub.f32 %v595_v37, %v1348_v27  ;;  %v630_v51 = vsub.f32 %v559_v63, %v1339_v33 }
 0x102   : > { %v738_v43 = vrot.slane %v737_v4, 2  ;;  %v725_v45 = vmax.f32 %v723_v44, %v724_v5  ;;  %v765_v50 = vmax.f32 %v763_v2, %v764_v15  ;;  %v684_v42 = vsel %vm652_vm9, %v636_v26, %v668_v25 }
 0x103   : > { %v744_v53 = vmax.f32 %v742_v14, %v743_v18  ;;  %v731_v59 = vrot.slane %v730_v22, 2  ;;  %vm655_vm10 = vcmp.ge.f32.partialorder %v639_v34, 0.0  ;;  %v749_v60 = vsel %vm692_vm3, %v684_v42, -inf }
 0x104   : > { %v739_v41 = vmax.f32 %v737_v4, %v738_v43  ;;  %v726_v29 = vrot.slane %v725_v45, 1  ;;  %v766_v40 = vrot.slane %v765_v50, 2  ;;  %v750_v37 = vrot.slane %v749_v60, 4 }
 0x105   : > { %v745_v1 = vrot.slane %v744_v53, 2  ;;  %v732_v27 = vmax.f32 %v730_v22, %v731_v59  ;;  %v671_v28 = vmul.f32 0.2, %v639_v34  ;;  %vm646_vm11 = vcmp.ge.f32.partialorder %v630_v51, 0.0 }
 0x106   : > { %v740_v24 = vrot.slane %v739_v41, 1  ;;  %v727_v44 = vmax.f32 %v725_v45, %v726_v29  ;;  %v767_v2 = vmax.f32 %v765_v50, %v766_v40  ;;  %v751_v5 = vmax.f32 %v749_v60, %v750_v37 }
 0x107   : > { %v746_v63 = vmax.f32 %v744_v53, %v745_v1  ;;  %v733_v33 = vrot.slane %v732_v27, 1  ;;  %v1785_v14 = vsel %vm655_vm10, %v639_v34, %v671_v28  ;;  %v662_v50 = vmul.f32 0.2, %v630_v51 }
 0x108   : > { %v741_v26 = vmax.f32 %v739_v41, %v740_v24  ;;  %v809_v4 = vsub.f32 %v1745_v35, %v727_v44  ;;  %v768_v15 = vrot.slane %v767_v2, 1  ;;  %v770_v18 = vsel %vm692_vm3, %v1785_v14, -inf }
 0x109   : > { %v747_v22 = vrot.slane %v746_v63, 1  ;;  %v734_v25 = vmax.f32 %v732_v27, %v733_v33  ;;  %v752_v43 = vrot.slane %v751_v5, 2  ;;  %v771_v59 = vrot.slane %v770_v18, 4 }
 0x10a   : > { %v811_v29 = vsub.f32 %v1756_v49, %v741_v26  ;;  %v829_v40 = vmul.f32 1.442695, %v809_v4  ;;  %v769_v45 = vmax.f32 %v767_v2, %v768_v15  ;;  %v1794_v60 = vsel %vm646_vm11, %v630_v51, %v662_v50 }
 0x10b   : > { %v748_v53 = vmax.f32 %v746_v63, %v747_v22  ;;  %v810_v28 = vsub.f32 %v1762_v58, %v734_v25  ;;  %v753_v34 = vmax.f32 %v751_v5, %v752_v43  ;;  %v772_v24 = vmax.f32 %v770_v18, %v771_v59 }
 0x10c   : > { %v833_v41 = vmul.f32 1.442695, %v811_v29  ;;  %1425 = vpow2.f32 %v829_v40  ;;  %v815_v35 = vsub.f32 %v1766_v61, %v769_v45  ;;  %v707_v2 = vsel %vm692_vm3, %v1794_v60, -inf }
 0x10d   : > { %v812_v1 = vsub.f32 %v1768_v62, %v748_v53  ;;  %v831_v27 = vmul.f32 1.442695, %v810_v28  ;;  %v754_v37 = vrot.slane %v753_v34, 1  ;;  %v773_v49 = vrot.slane %v772_v24, 2 }
 0x10e   : > { %1427 = vpow2.f32 %v833_v41  ;;  %v841_v44 = vmul.f32 1.442695, %v815_v35  ;;  %v637_v58 = vsub.f32 %v587_v17, %v1748_v32  ;;  %v708_v33 = vrot.slane %v707_v2, 4 }
 0x10f   : > { %v835_v63 = vmul.f32 1.442695, %v812_v1  ;;  %1429 = vpow2.f32 %v831_v27  ;;  %v755_v61 = vmax.f32 %v753_v34, %v754_v37  ;;  %v774_v51 = vmax.f32 %v772_v24, %v773_v49 }
 0x110   : > { %1431 = vpow2.f32 %v841_v44  ;;  %vm653_vm12 = vcmp.ge.f32.partialorder %v637_v58, 0.0  ;;  %v669_v62 = vmul.f32 0.2, %v637_v58  ;;  %v628_v4 = vsub.f32 %v551_v56, %v1750_v38 }
 0x111   : > { %1433 = vpow2.f32 %v835_v63  ;;  %v813_v5 = vsub.f32 %v684_v42, %v755_v61  ;;  %v775_v26 = vrot.slane %v774_v51, 1  ;;  %v709_v15 = vmax.f32 %v707_v2, %v708_v33 }
 0x112   : > { %v1807_v18 = vsel %vm653_vm12, %v637_v58, %v669_v62  ;;  %v563_v57 = vrot.slane %v497_v0, %v1702_v31  ;;  %v555_v17 = vrot.slane %v1714_v47, %v1702_v31  ;;  %vm644_vm13 = vcmp.ge.f32.partialorder %v628_v4, 0.0 }
 0x113   : > { %v837_v32 = vmul.f32 1.442695, %v813_v5  ;;  %v776_v22 = vmax.f32 %v774_v51, %v775_v26  ;;  %v756_v42 = vsel %vm692_vm3, %v1807_v18, -inf  ;;  %v710_v25 = vrot.slane %v709_v15, 2 }
 0x114   : > { %v757_v36 = vrot.slane %v756_v42, 4  ;;  %v660_v56 = vmul.f32 0.2, %v628_v4  ;;  %v1818_v38 = vsub.f32 %v563_v57, %v1754_v46  ;;  %v855_v43 = vunpack.c.l.bf16 %v1678_v12 }
 0x115   : > { %v856_v59 = vunpack.c.h.bf16 %v1678_v12  ;;  %v816_v0 = vsub.f32 %v1785_v14, %v776_v22  ;;  %v1824_v47 = vsub.f32 %v555_v17, %v1758_v52  ;;  %v867_v45 = vunpack.c.l.bf16 %v1686_v13 }
 0x116   : > { %v1426_v29 = vpop.eup %1425  ;;  %v515_v50 = vcombine.high %v1717_v48, %v1717_v48  ;;  %v1830_v53 = vsel %vm644_vm13, %v628_v4, %v660_v56  ;;  %1435 = vpow2.f32 %v837_v32  ;;  %v1835_v24 = vmax.f32 %v709_v15, %v710_v25 }
 0x117   : > { %v873_v46 = vmul.f32 %v1426_v29, %v857_v20  ;;  %v1025_v28 = vsel %vm692_vm3, %v1426_v29, 0.0  ;;  %v843_v14 = vmul.f32 1.442695, %v816_v0  ;;  %v1837_v41 = vmax.f32 %v756_v42, %v757_v36 }
 0x118   : > { %v1428_v34 = vpop.eup %1427  ;;  %v1026_v52 = vrot.slane %v1025_v28, 4  ;;  %v545_v35 = vcombine.high %v1724_v54, %v1724_v54  ;;  %v1847_v49 = vsel %vm692_vm3, %v1830_v53, -inf  ;;  %v2103_v57 = vunpack.c.h.bf16 %v1654_v7 }
 0x119   : > { %v1430_v1 = vpop.eup %1429  ;;  %v875_v27 = vmul.f32 %v1428_v34, %v859_v23  ;;  %v1039_v37 = vsel %vm692_vm3, %v1428_v34, 0.0  ;;  %v913_v20 = vsel %vm692_vm3, %v873_v46, 0.0  ;;  %1437 = vpow2.f32 %v843_v14 }
 0x11a   : > { %v1432_v44 = vpop.eup %1431  ;;  %v1040_v2 = vrot.slane %v1039_v37, 4  ;;  %v914_v58 = vrot.slane %v913_v20, 4  ;;  %v1027_v63 = vadd.f32 %v1026_v52, %v1025_v28  ;;  %v874_v61 = vmul.f32 %v1430_v1, %v858_v21 }
 0x11b   : > { %v1434_v51 = vpop.eup %1433  ;;  %v927_v33 = vsel %vm692_vm3, %v875_v27, 0.0  ;;  %v1032_v23 = vsel %vm692_vm3, %v1430_v1, 0.0  ;;  %v879_v62 = vmul.f32 %v1432_v44, %v863_v30  ;;  %vm647_vm14 = vcmp.ge.f32.partialorder %v1818_v38, 0.0 }
 0x11c   : > { %v928_v5 = vrot.slane %v927_v33, 4  ;;  %v1041_v26 = vadd.f32 %v1040_v2, %v1039_v37  ;;  %v915_v4 = vadd.f32 %v914_v58, %v913_v20  ;;  %v1028_v15 = vrot.slane %v1027_v63, 2 }
 0x11d   : > { %v876_v17 = vmul.f32 %v1434_v51, %v2103_v57  ;;  %v1046_v32 = vsel %vm692_vm3, %v1434_v51, 0.0  ;;  %v920_v6 = vsel %vm692_vm3, %v874_v61, 0.0  ;;  %v1033_v21 = vrot.slane %v1032_v23, 4 }
 0x11e   : > { %v929_v22 = vadd.f32 %v928_v5, %v927_v33  ;;  %v1042_v42 = vrot.slane %v1041_v26, 2  ;;  %v916_v25 = vrot.slane %v915_v4, 2  ;;  %v1029_v36 = vadd.f32 %v1028_v15, %v1027_v63 }
 0x11f   : > { %v934_v56 = vsel %vm692_vm3, %v876_v17, 0.0  ;;  %v1047_v30 = vrot.slane %v1046_v32, 4  ;;  %v921_v0 = vrot.slane %v920_v6, 4  ;;  %v1034_v29 = vadd.f32 %v1033_v21, %v1032_v23 }
 0x120   : > { %v930_v46 = vrot.slane %v929_v22, 2  ;;  %v1043_v28 = vadd.f32 %v1042_v42, %v1041_v26  ;;  %v917_v14 = vadd.f32 %v916_v25, %v915_v4  ;;  %v1030_v34 = vrot.slane %v1029_v36, 1  ;;  %v1436_v7 = vpop.eup %1435 }
 0x121   : > { %v935_v52 = vrot.slane %v934_v56, 4  ;;  %v1048_v1 = vadd.f32 %v1047_v30, %v1046_v32  ;;  %v922_v27 = vadd.f32 %v921_v0, %v920_v6  ;;  %v1035_v37 = vrot.slane %v1034_v29, 2 }
 0x122   : > { %v1044_v20 = vrot.slane %v1043_v28, 1  ;;  %v918_v2 = vrot.slane %v917_v14, 1  ;;  %v1031_v58 = vadd.f32 %v1030_v34, %v1029_v36  ;;  %v1067_v61 = vsel %vm692_vm3, %v1432_v44, 0.0 }
 0x123   : > { %v1861_v63 = vadd.f32 %v935_v52, %v934_v56  ;;  %v1049_v51 = vrot.slane %v1048_v1, 2  ;;  %v923_v33 = vrot.slane %v922_v27, 2  ;;  %v1036_v5 = vadd.f32 %v1035_v37, %v1034_v29  ;;  %v1438_v57 = vpop.eup %1437 }
 0x124   : > { %v955_v23 = vsel %vm692_vm3, %v879_v62, 0.0  ;;  %v712_v26 = vrot.slane %v1835_v24, 1  ;;  %v759_v4 = vrot.slane %v1837_v41, 2  ;;  %v694_v15 = vrot.slane %v1847_v49, 4 }
 0x125   : > { %v1867_v17 = vadd.f32 %v930_v46, %v929_v22  ;;  %v1045_v32 = vadd.f32 %v1044_v20, %v1043_v28  ;;  %v1869_v6 = vadd.f32 %v918_v2, %v917_v14  ;;  %v1050_v44 = vadd.f32 %v1049_v51, %v1048_v1 }
 0x126   : > { %v1871_v21 = vadd.f32 %v923_v33, %v922_v27  ;;  %v956_v42 = vrot.slane %v955_v23, 4  ;;  %v1068_v25 = vrot.slane %v1067_v61, 4  ;;  %v2104_v36 = vunpack.c.l.bf16 %v1657_v8 }
 0x127   : > { %1439 = vrcp.f32 %v1031_v58  ;;  %v1037_v30 = vrot.slane %v1036_v5, 1  ;;  %v1053_v0 = vsel %vm692_vm3, %v1436_v7, 0.0  ;;  %v1051_v14 = vrot.slane %v1050_v44, 1 }
 0x128   : > { %v877_v62 = vmul.f32 %v1436_v7, %v2104_v36  ;;  %v957_v29 = vadd.f32 %v956_v42, %v955_v23  ;;  %v1069_v22 = vadd.f32 %v1068_v25, %v1067_v61  ;;  %v1054_v28 = vrot.slane %v1053_v0, 4 }
 0x129   : > { %1441 = vrcp.f32 %v1045_v32  ;;  %v2105_v52 = vunpack.c.h.bf16 %v1670_v10  ;;  %v925_v27 = vrot.slane %v1871_v21, 1  ;;  %v1074_v2 = vsel %vm692_vm3, %v1438_v57, 0.0 }
 0x12a   : > { %v941_v46 = vsel %vm692_vm3, %v877_v62, 0.0  ;;  %v1070_v37 = vrot.slane %v1069_v22, 2  ;;  %v1055_v20 = vadd.f32 %v1054_v28, %v1053_v0  ;;  %v958_v58 = vrot.slane %v957_v29, 2 }
 0x12b   : > { %v942_v34 = vrot.slane %v941_v46, 4  ;;  %v880_v1 = vmul.f32 %v1438_v57, %v2105_v52  ;;  %v1075_v61 = vrot.slane %v1074_v2, 4  ;;  %v1038_v33 = vadd.f32 %v1037_v30, %v1036_v5 }
 0x12c   : > { %v1071_v23 = vadd.f32 %v1070_v37, %v1069_v22  ;;  %v1056_v32 = vrot.slane %v1055_v20, 2  ;;  %v713_v36 = vmax.f32 %v1835_v24, %v712_v26  ;;  %v760_v62 = vmax.f32 %v1837_v41, %v759_v4 }
 0x12d   : > { %v943_v51 = vadd.f32 %v942_v34, %v941_v46  ;;  %v962_v7 = vsel %vm692_vm3, %v880_v1, 0.0  ;;  %v1076_v10 = vadd.f32 %v1075_v61, %v1074_v2  ;;  %v1886_v0 = vadd.f32 %v1051_v14, %v1050_v44 }
 0x12e   : > { %v963_v42 = vrot.slane %v962_v7, 4  ;;  %v1072_v57 = vrot.slane %v1071_v23, 1  ;;  %v1057_v28 = vadd.f32 %v1056_v32, %v1055_v20  ;;  %v959_v34 = vadd.f32 %v958_v58, %v957_v29 }
 0x12f   : > { %v944_v25 = vrot.slane %v943_v51, 2  ;;  %v1077_v52 = vrot.slane %v1076_v10, 2  ;;  %v807_v1 = vsub.f32 %v1794_v60, %v713_v36  ;;  %v761_v40 = vrot.slane %v760_v62, 1 }
 0x130   : > { %v964_v46 = vadd.f32 %v963_v42, %v962_v7  ;;  %v1073_v5 = vadd.f32 %v1072_v57, %v1071_v23  ;;  %v1058_v22 = vrot.slane %v1057_v28, 1  ;;  %1443 = vrcp.f32 %v1038_v33 }
 0x131   : > { %v945_v30 = vadd.f32 %v944_v25, %v943_v51  ;;  %v1889_v56 = vpop.eup %1439  ;;  %v1078_v24 = vadd.f32 %v1077_v52, %v1076_v10  ;;  %v825_v26 = vmul.f32 1.442695, %v807_v1  ;;  %v762_v41 = vmax.f32 %v760_v62, %v761_v40 }
 0x132   : > { %v965_v37 = vrot.slane %v964_v46, 2  ;;  %1445 = vrcp.f32 %v1073_v5  ;;  %v1059_v4 = vadd.f32 %v1058_v22, %v1057_v28  ;;  %v695_v14 = vmax.f32 %v1847_v49, %v694_v15 }
 0x133   : > { %v1892_v29 = vpop.eup %1441  ;;  %v960_v20 = vrot.slane %v959_v34, 1  ;;  %v1079_v60 = vrot.slane %v1078_v24, 1  ;;  %1447 = vpow2.f32 %v825_v26  ;;  %v814_v2 = vsub.f32 %v1807_v18, %v762_v41 }
 0x134   : > { %v966_v44 = vadd.f32 %v965_v37, %v964_v46  ;;  %v946_v58 = vrot.slane %v945_v30, 1  ;;  %1449 = vrcp.f32 %v1059_v4  ;;  %v696_v51 = vrot.slane %v695_v14, 2 }
 0x135   : > { %v663_v7 = vmul.f32 0.2, %v1818_v38  ;;  %v1080_v61 = vadd.f32 %v1079_v60, %v1078_v24  ;;  %v839_v33 = vmul.f32 1.442695, %v814_v2  ;;  %vm645_vm15 = vcmp.ge.f32.partialorder %v1824_v47, 0.0 }
 0x136   : > { %v661_v40 = vmul.f32 0.2, %v1824_v47  ;;  %v967_v23 = vrot.slane %v966_v44, 1  ;;  %v697_v49 = vmax.f32 %v695_v14, %v696_v51  ;;  %v607_v18 = vrot.slane %v545_v35, %v1702_v31 }
 0x137   : > { %v1901_v15 = vsel %vm647_vm14, %v1818_v38, %v663_v7  ;;  %1451 = vrcp.f32 %v1080_v61  ;;  %v599_v25 = vrot.slane %v1724_v54, %v1702_v31  ;;  %v961_v28 = vadd.f32 %v960_v20, %v959_v34 }
 0x138   : > { %v714_v32 = vsel %vm692_vm3, %v1901_v15, -inf  ;;  %v1910_v42 = vsel %vm645_vm15, %v1824_v47, %v661_v40  ;;  %1453 = vpow2.f32 %v839_v33  ;;  %v698_v10 = vrot.slane %v697_v49, 1 }
 0x139   : > { %v715_v36 = vrot.slane %v714_v32, 4  ;;  %v700_v38 = vsel %vm692_vm3, %v1910_v42, -inf  ;;  %v642_v57 = vsub.f32 %v607_v18, %v1772_v3  ;;  %v640_v35 = vsub.f32 %v599_v25, %v1776_v16 }
 0x13a   : > { %v701_v62 = vrot.slane %v700_v38, 4  ;;  %v1922_v47 = vrot.slane %v515_v50, %v1692_v19  ;;  %v947_v46 = vadd.f32 %v946_v58, %v945_v30  ;;  %v699_v54 = vmax.f32 %v697_v49, %v698_v10  ;;  %v1924_v1 = vpop.eup %1443 }
 0x13b   : > { %v716_v52 = vmax.f32 %v714_v32, %v715_v36  ;;  %v968_v5 = vadd.f32 %v967_v23, %v966_v44  ;;  %vm658_vm0 = vcmp.ge.f32.partialorder %v642_v57, 0.0  ;;  %v674_v37 = vmul.f32 0.2, %v642_v57 }
 0x13c   : > { %v702_v22 = vmax.f32 %v700_v38, %v701_v62  ;;  %v1446_v24 = vpop.eup %1445  ;;  %v805_v3 = vsub.f32 %v1830_v53, %v699_v54  ;;  %vm656_vm1 = vcmp.ge.f32.partialorder %v640_v35, 0.0  ;;  %v672_v26 = vmul.f32 0.2, %v640_v35 }
 0x13d   : > { %v717_v16 = vrot.slane %v716_v52, 2  ;;  %v1448_v41 = vpop.eup %1447  ;;  %v1927_v48 = vmul.f32 %v1446_v24, %v961_v28  ;;  %v1929_v50 = vsel %vm658_vm0, %v642_v57, %v674_v37  ;;  %v547_v34 = vcombine.high %v1922_v47, %v1922_v47 }
 0x13e   : > { %v703_v19 = vrot.slane %v702_v22, 2  ;;  %v1450_v30 = vpop.eup %1449  ;;  %v871_v4 = vmul.f32 %v1448_v41, %v855_v43  ;;  %v1011_v44 = vsel %vm692_vm3, %v1448_v41, 0.0  ;;  %v821_v14 = vmul.f32 1.442695, %v805_v3 }
 0x13f   : > { %v718_v53 = vmax.f32 %v716_v52, %v717_v16  ;;  %v1936_v20 = vmul.f32 %v1450_v30, %v947_v46  ;;  %v1012_v60 = vrot.slane %v1011_v44, 4  ;;  %v791_v58 = vsel %vm692_vm3, %v1929_v50, -inf }
 0x140   : > { %v704_v2 = vmax.f32 %v702_v22, %v703_v19  ;;  %v899_v51 = vsel %vm692_vm3, %v871_v4, 0.0  ;;  %1455 = vpow2.f32 %v821_v14  ;;  %v792_v61 = vrot.slane %v791_v58, 4 }
 0x141   : > { %v719_v7 = vrot.slane %v718_v53, 1  ;;  %v1452_v33 = vpop.eup %1451  ;;  %v900_v40 = vrot.slane %v899_v51, 4  ;;  %v1013_v23 = vadd.f32 %v1012_v60, %v1011_v44  ;;  %v1942_v49 = vsel %vm656_vm1, %v640_v35, %v672_v26 }
 0x142   : > { %v705_v43 = vrot.slane %v704_v2, 1  ;;  %v1454_v18 = vpop.eup %1453  ;;  %v1944_v32 = vmul.f32 %v1452_v33, %v968_v5  ;;  %v793_v10 = vmax.f32 %v791_v58, %v792_v61  ;;  %v777_v36 = vsel %vm692_vm3, %v1942_v49, -inf }
 0x143   : > { %v720_v25 = vmax.f32 %v718_v53, %v719_v7  ;;  %v901_v38 = vadd.f32 %v900_v40, %v899_v51  ;;  %v1014_v62 = vrot.slane %v1013_v23, 2  ;;  %v2106_v57 = vunpack.c.h.bf16 %v1657_v8 }
 0x144   : > { %v1060_v46 = vsel %vm692_vm3, %v1454_v18, 0.0  ;;  %v706_v35 = vmax.f32 %v704_v2, %v705_v43  ;;  %v794_v22 = vrot.slane %v793_v10, 2  ;;  %v778_v3 = vrot.slane %v777_v36, 4 }
 0x145   : > { %v878_v28 = vmul.f32 %v1454_v18, %v2106_v57  ;;  %v1061_v54 = vrot.slane %v1060_v46, 4  ;;  %v808_v52 = vsub.f32 %v1901_v15, %v720_v25  ;;  %v902_v37 = vrot.slane %v901_v38, 2 }
 0x146   : > { %v1015_v5 = vadd.f32 %v1014_v62, %v1013_v23  ;;  %v806_v19 = vsub.f32 %v1910_v42, %v706_v35  ;;  %v795_v4 = vmax.f32 %v793_v10, %v794_v22  ;;  %v779_v44 = vmax.f32 %v777_v36, %v778_v3 }
 0x147   : > { %v948_v24 = vsel %vm692_vm3, %v878_v28, 0.0  ;;  %v1062_v26 = vadd.f32 %v1061_v54, %v1060_v46  ;;  %v827_v41 = vmul.f32 1.442695, %v808_v52  ;;  %v903_v30 = vadd.f32 %v902_v37, %v901_v38 }
 0x148   : > { %v949_v16 = vrot.slane %v948_v24, 4  ;;  %v1016_v8 = vrot.slane %v1015_v5, 1  ;;  %v823_v15 = vmul.f32 1.442695, %v806_v19  ;;  %v796_v2 = vrot.slane %v795_v4, 1 }
 0x149   : > { %v1063_v53 = vrot.slane %v1062_v26, 2  ;;  %1457 = vpow2.f32 %v827_v41  ;;  %v780_v58 = vrot.slane %v779_v44, 2  ;;  %v603_v51 = vrot.slane %v1922_v47, %v1702_v31 }
 0x14a   : > { %v950_v14 = vadd.f32 %v949_v16, %v948_v24  ;;  %v1017_v60 = vadd.f32 %v1016_v8, %v1015_v5  ;;  %v1456_v7 = vpop.eup %1455  ;;  %v904_v61 = vrot.slane %v903_v30, 1  ;;  %1459 = vpow2.f32 %v823_v15 }
 0x14b   : > { %v1064_v40 = vadd.f32 %v1063_v53, %v1062_v26  ;;  %v2107_v42 = vunpack.c.l.bf16 %v1660_v9  ;;  %v997_v43 = vsel %vm692_vm3, %v1456_v7, 0.0  ;;  %v611_v18 = vrot.slane %v547_v34, %v1702_v31 }
 0x14c   : > { %v951_v33 = vrot.slane %v950_v14, 2  ;;  %1461 = vrcp.f32 %v1017_v60  ;;  %v998_v36 = vrot.slane %v997_v43, 4  ;;  %v797_v38 = vmax.f32 %v795_v4, %v796_v2 }
 0x14d   : > { %v869_v23 = vmul.f32 %v1456_v7, %v2107_v42  ;;  %v1065_v10 = vrot.slane %v1064_v40, 1  ;;  %v781_v47 = vmax.f32 %v779_v44, %v780_v58  ;;  %v643_v57 = vsub.f32 %v611_v18, %v1778_v39 }
 0x14e   : > { %v952_v25 = vadd.f32 %v951_v33, %v950_v14  ;;  %v641_v28 = vsub.f32 %v603_v51, %v1780_v55  ;;  %v999_v35 = vadd.f32 %v998_v36, %v997_v43  ;;  %v819_v22 = vsub.f32 %v1929_v50, %v797_v38 }
 0x14f   : > { %v885_v62 = vsel %vm692_vm3, %v869_v23, 0.0  ;;  %v1066_v54 = vadd.f32 %v1065_v10, %v1064_v40  ;;  %v782_v37 = vrot.slane %v781_v47, 1  ;;  %vm659_vm2 = vcmp.ge.f32.partialorder %v643_v57, 0.0 }
 0x150   : > { %v953_v46 = vrot.slane %v952_v25, 1  ;;  %v886_v52 = vrot.slane %v885_v62, 4  ;;  %v675_v31 = vmul.f32 0.2, %v643_v57  ;;  %v905_v34 = vadd.f32 %v904_v61, %v903_v30 }
 0x151   : > { %1463 = vrcp.f32 %v1066_v54  ;;  %v1000_v24 = vrot.slane %v999_v35, 2  ;;  %v849_v16 = vmul.f32 1.442695, %v819_v22  ;;  %v783_v26 = vmax.f32 %v781_v47, %v782_v37 }
 0x152   : > { %v887_v5 = vadd.f32 %v886_v52, %v885_v62  ;;  %v954_v3 = vadd.f32 %v953_v46, %v952_v25  ;;  %v1964_v41 = vsel %vm659_vm2, %v643_v57, %v675_v31  ;;  %v673_v4 = vmul.f32 0.2, %v641_v28 }
 0x153   : > { %v1458_v39 = vpop.eup %1457  ;;  %v1001_v19 = vadd.f32 %v1000_v24, %v999_v35  ;;  %v798_v8 = vsel %vm692_vm3, %v1964_v41, -inf  ;;  %1465 = vpow2.f32 %v849_v16  ;;  %v817_v44 = vsub.f32 %v1942_v49, %v783_v26 }
 0x154   : > { %v888_v55 = vrot.slane %v887_v5, 2  ;;  %v872_v50 = vmul.f32 %v1458_v39, %v856_v59  ;;  %v1018_v30 = vsel %vm692_vm3, %v1458_v39, 0.0  ;;  %v1460_v14 = vpop.eup %1459  ;;  %v799_v2 = vrot.slane %v798_v8, 4 }
 0x155   : > { %v1002_v15 = vrot.slane %v1001_v19, 1  ;;  %v1019_v60 = vrot.slane %v1018_v30, 4  ;;  %v2108_v7 = vunpack.c.h.bf16 %v1660_v9  ;;  %v1004_v33 = vsel %vm692_vm3, %v1460_v14, 0.0 }
 0x156   : > { %v889_v53 = vadd.f32 %v888_v55, %v887_v5  ;;  %v1462_v58 = vpop.eup %1461  ;;  %v906_v51 = vsel %vm692_vm3, %v872_v50, 0.0  ;;  %v845_v12 = vmul.f32 1.442695, %v817_v44  ;;  %vm657_vm4 = vcmp.ge.f32.partialorder %v641_v28, 0.0 }
 0x157   : > { %v870_v61 = vmul.f32 %v1460_v14, %v2108_v7  ;;  %v1976_v59 = vmul.f32 %v1462_v58, %v905_v34  ;;  %v1003_v40 = vadd.f32 %v1002_v15, %v1001_v19  ;;  %v907_v42 = vrot.slane %v906_v51, 4 }
 0x158   : > { %v1020_v49 = vadd.f32 %v1019_v60, %v1018_v30  ;;  %v1005_v43 = vrot.slane %v1004_v33, 4  ;;  %1467 = vpow2.f32 %v845_v12  ;;  %v890_v18 = vrot.slane %v889_v53, 1 }
 0x159   : > { %v892_v23 = vsel %vm692_vm3, %v870_v61, 0.0  ;;  %1469 = vrcp.f32 %v1003_v40  ;;  %v908_v25 = vadd.f32 %v907_v42, %v906_v51  ;;  %v800_v38 = vmax.f32 %v798_v8, %v799_v2 }
 0x15a   : > { %v893_v10 = vrot.slane %v892_v23, 4  ;;  %v1021_v36 = vrot.slane %v1020_v49, 2  ;;  %v1006_v9 = vadd.f32 %v1005_v43, %v1004_v33  ;;  %v1979_v62 = vsel %vm657_vm4, %v641_v28, %v673_v4 }
 0x15b   : > { %v1464_v47 = vpop.eup %1463  ;;  %1471 = vrcp.f32 %v1886_v0  ;;  %v784_v46 = vsel %vm692_vm3, %v1979_v62, -inf  ;;  %v932_v54 = vrot.slane %v1867_v17, 1  ;;  %v801_v37 = vrot.slane %v800_v38, 2 }
 0x15c   : > { %v894_v57 = vadd.f32 %v893_v10, %v892_v23  ;;  %v1985_v52 = vmul.f32 %v1464_v47, %v954_v3  ;;  %v1022_v35 = vadd.f32 %v1021_v36, %v1020_v49  ;;  %v1007_v22 = vrot.slane %v1006_v9, 2 }
 0x15d   : > { %v891_v31 = vadd.f32 %v890_v18, %v889_v53  ;;  %v909_v34 = vrot.slane %v908_v25, 2  ;;  %v785_v5 = vrot.slane %v784_v46, 4  ;;  %v926_v28 = vadd.f32 %v925_v27, %v1871_v21  ;;  %v1466_v24 = vpop.eup %1465 }
 0x15e   : > { %v1023_v0 = vrot.slane %v1022_v35, 1  ;;  %v1008_v16 = vadd.f32 %v1007_v22, %v1006_v9  ;;  %v802_v26 = vmax.f32 %v800_v38, %v801_v37  ;;  %v1992_v39 = vmul.f32 %v1889_v56, %v1869_v6 }
 0x15f   : > { %v895_v3 = vrot.slane %v894_v57, 2  ;;  %v883_v55 = vmul.f32 %v1466_v24, %v867_v45  ;;  %v1095_v19 = vsel %vm692_vm3, %v1466_v24, 0.0  ;;  %v933_v8 = vadd.f32 %v932_v54, %v1867_v17 }
 0x160   : > { %v1024_v4 = vadd.f32 %v1023_v0, %v1022_v35  ;;  %v1009_v50 = vrot.slane %v1008_v16, 1  ;;  %v1096_v30 = vrot.slane %v1095_v19, 4  ;;  %v803_v21 = vrot.slane %v802_v26, 1 }
 0x161   : > { %v910_v27 = vadd.f32 %v909_v34, %v908_v25  ;;  %v983_v44 = vsel %vm692_vm3, %v883_v55, 0.0  ;;  %v786_v14 = vmax.f32 %v784_v46, %v785_v5  ;;  %v2109_v6 = vrot.slane %v1861_v63, 2 }
 0x162   : > { %v1468_v53 = vpop.eup %1467  ;;  %1473 = vrcp.f32 %v1024_v4  ;;  %v1010_v13 = vadd.f32 %v1009_v50, %v1008_v16  ;;  %v984_v45 = vrot.slane %v983_v44, 4  ;;  %v1097_v15 = vadd.f32 %v1096_v30, %v1095_v19 }
 0x163   : > { %v938_v56 = vadd.f32 %v2109_v6, %v1861_v63  ;;  %v1470_v60 = vpop.eup %1469  ;;  %v896_v2 = vadd.f32 %v895_v3, %v894_v57  ;;  %v2110_v17 = vunpack.c.l.bf16 %v1675_v11  ;;  %v1081_v51 = vsel %vm692_vm3, %v1468_v53, 0.0 }
 0x164   : > { %v804_v7 = vmax.f32 %v802_v26, %v803_v21  ;;  %v1125_v61 = vmul.f32 %v1470_v60, %v891_v31  ;;  %1475 = vrcp.f32 %v1010_v13  ;;  %v985_v33 = vadd.f32 %v984_v45, %v983_v44  ;;  %v1489_v21 = vld [vmem:[%s1648_s17 + $0x38] sm:$0xff]  }
 0x165   : > { %v881_v58 = vmul.f32 %v1468_v53, %v2110_v17  ;;  %v1098_v12 = vrot.slane %v1097_v15, 2  ;;  %v1472_v40 = vpop.eup %1471  ;;  %v1082_v42 = vrot.slane %v1081_v51, 4  ;;  %v787_v23 = vrot.slane %v786_v14, 2 }
 0x166   : > { %v820_v49 = vsub.f32 %v1964_v41, %v804_v7  ;;  %v911_v43 = vrot.slane %v910_v27, 1  ;;  %v939_v10 = vrot.slane %v938_v56, 1  ;;  %v1130_v38 = vmul.f32 %v1924_v1, %v926_v28 }
 0x167   : > { %v969_v63 = vsel %vm692_vm3, %v881_v58, 0.0  ;;  %v1099_v18 = vadd.f32 %v1098_v12, %v1097_v15  ;;  %v1083_v11 = vadd.f32 %v1082_v42, %v1081_v51  ;;  %v788_v9 = vmax.f32 %v786_v14, %v787_v23 }
 0x168   : > { %v970_v25 = vrot.slane %v969_v63, 4  ;;  %v851_v36 = vmul.f32 1.442695, %v820_v49  ;;  %v897_v47 = vrot.slane %v896_v2, 1  ;;  %v986_v57 = vrot.slane %v985_v33, 2 }
 0x169   : > { %v1100_v46 = vrot.slane %v1099_v18, 1  ;;  %v940_v54 = vadd.f32 %v939_v10, %v938_v56  ;;  %v1084_v35 = vrot.slane %v1083_v11, 2  ;;  %v789_v22 = vrot.slane %v788_v9, 1 }
 0x16a   : > { %1477 = vpow2.f32 %v851_v36  ;;  %v1131_v37 = vmul.f32 %v1892_v29, %v933_v8  ;;  %v971_v31 = vadd.f32 %v970_v25, %v969_v63  ;;  %v912_v5 = vadd.f32 %v911_v43, %v910_v27 }
 0x16b   : > { %v1101_v41 = vadd.f32 %v1100_v46, %v1099_v18  ;;  %v1132_v34 = vmul.f32 %v1472_v40, %v940_v54  ;;  %v1085_v24 = vadd.f32 %v1084_v35, %v1083_v11  ;;  %v790_v0 = vmax.f32 %v788_v9, %v789_v22 }
 0x16c   : > { %v1474_v16 = vpop.eup %1473  ;;  %v898_v26 = vadd.f32 %v897_v47, %v896_v2  ;;  %v987_v1 = vadd.f32 %v986_v57, %v985_v33  ;;  %vm1157_vm5 = vcmask 1041409   ;;  %vm1159_vm6 = vcmask 1042434  }
 0x16d   : > { %1479 = vrcp.f32 %v1101_v41  ;;  %v1128_v28 = vmul.f32 %v1474_v16, %v912_v5  ;;  %v1086_v3 = vrot.slane %v1085_v24, 1  ;;  %v818_v55 = vsub.f32 %v1979_v62, %v790_v0 }
 0x16e   : > { %v1476_v19 = vpop.eup %1475  ;;  %v972_v29 = vrot.slane %v971_v31, 2  ;;  %vm1161_vm7 = vcmask 1043459   ;;  %v1171_v30 = vsel %vm1157_vm5, %v1985_v52, %v1936_v20  ;;  %v868_v27 = vunpack.c.h.bf16 %v1489_v21 }
 0x16f   : > { %v1126_v8 = vmul.f32 %v1476_v19, %v898_v26  ;;  %v1087_v4 = vadd.f32 %v1086_v3, %v1085_v24  ;;  %v847_v50 = vmul.f32 1.442695, %v818_v55  ;;  %v988_v44 = vrot.slane %v987_v1, 1 }
 0x170   : > { %v1172_v14 = vsel %vm1159_vm6, %v1927_v48, %v1171_v30  ;;  %vm1163_vm8 = vcmask 1044484   ;;  %v973_v56 = vadd.f32 %v972_v29, %v971_v31  ;;  %vm1165_vm9 = vcmask 1045509  }
 0x171   : > { %1481 = vrcp.f32 %v1087_v4  ;;  %v1158_v62 = vsel %vm1157_vm5, %v1126_v8, %v1125_v61  ;;  %v1173_v6 = vsel %vm1161_vm7, %v1944_v32, %v1172_v14  ;;  %vm1167_vm10 = vcmask 1046534  }
 0x172   : > { %1483 = vpow2.f32 %v847_v50  ;;  %v1160_v20 = vsel %vm1159_vm6, %v1976_v59, %v1158_v62  ;;  %vm1169_vm11 = vcmask 1047559   ;;  %v989_v15 = vadd.f32 %v988_v44, %v987_v1 }
 0x173   : > { %v1162_v53 = vsel %vm1161_vm7, %v1128_v28, %v1160_v20  ;;  %v974_v17 = vrot.slane %v973_v56, 1 }
 0x174   : > { %v1478_v52 = vpop.eup %1477  ;;  %v1164_v45 = vsel %vm1163_vm8, %v1992_v39, %v1162_v53  ;;  %v1490_v39 = vld [vmem:[%s1648_s17 + $0x30] sm:$0xff]  }
 0x175   : > { %v884_v48 = vmul.f32 %v1478_v52, %v868_v27  ;;  %v1102_v13 = vsel %vm692_vm3, %v1478_v52, 0.0  ;;  %v1166_v60 = vsel %vm1165_vm9, %v1130_v38, %v1164_v45  ;;  %v866_v12 = vunpack.c.h.bf16 %v1490_v39 }
 0x176   : > { %v1103_v32 = vrot.slane %v1102_v13, 4  ;;  %v1168_v58 = vsel %vm1167_vm10, %v1131_v37, %v1166_v60  ;;  %v975_v63 = vadd.f32 %v974_v17, %v973_v56 }
 0x177   : > { %v1480_v2 = vpop.eup %1479  ;;  %v990_v59 = vsel %vm692_vm3, %v884_v48, 0.0  ;;  %v1170_v33 = vsel %vm1169_vm11, %v1132_v34, %v1168_v58 }
 0x178   : > { %v991_v51 = vrot.slane %v990_v59, 4  ;;  %v1104_v7 = vadd.f32 %v1103_v32, %v1102_v13  ;;  %v1139_v61 = vmul.f32 %v1480_v2, %v989_v15  ;;  %1180 = vst.msk [vmem:[%s2032_s24] sm:$0xff] %vm692_vm3, %v1170_v33 }
 0x17a   : > { %v1105_v40 = vrot.slane %v1104_v7, 2  ;;  %v992_v42 = vadd.f32 %v991_v51, %v990_v59 }
 0x17b   : > { %v1482_v49 = vpop.eup %1481 }
 0x17c   : > { %v1106_v23 = vadd.f32 %v1105_v40, %v1104_v7  ;;  %v1484_v43 = vpop.eup %1483  ;;  %v1137_v18 = vmul.f32 %v1482_v49, %v975_v63  ;;  %v993_v36 = vrot.slane %v992_v42, 2 }
 0x17d   : > { %v882_v10 = vmul.f32 %v1484_v43, %v866_v12  ;;  %v1088_v11 = vsel %vm692_vm3, %v1484_v43, 0.0 }
 0x17e   : > { %v1107_v25 = vrot.slane %v1106_v23, 1  ;;  %v1089_v9 = vrot.slane %v1088_v11, 4  ;;  %v1174_v38 = vsel %vm1163_vm8, %v1137_v18, %v1173_v6  ;;  %v994_v22 = vadd.f32 %v993_v36, %v992_v42 }
 0x17f   : > { %v976_v57 = vsel %vm692_vm3, %v882_v10, 0.0 }
 0x180   : > { %v1108_v47 = vadd.f32 %v1107_v25, %v1106_v23  ;;  %v977_v46 = vrot.slane %v976_v57, 4  ;;  %v1090_v54 = vadd.f32 %v1089_v9, %v1088_v11  ;;  %v995_v34 = vrot.slane %v994_v22, 1 }
 0x182   : > { %1485 = vrcp.f32 %v1108_v47  ;;  %v1091_v35 = vrot.slane %v1090_v54, 2  ;;  %v978_v37 = vadd.f32 %v977_v46, %v976_v57  ;;  %v996_v0 = vadd.f32 %v995_v34, %v994_v22 }
 0x184   : > { %v1092_v41 = vadd.f32 %v1091_v35, %v1090_v54  ;;  %v979_v5 = vrot.slane %v978_v37, 2 }
 0x186   : > { %v1093_v31 = vrot.slane %v1092_v41, 1  ;;  %v980_v26 = vadd.f32 %v979_v5, %v978_v37 }
 0x188   : > { %v1094_v24 = vadd.f32 %v1093_v31, %v1092_v41  ;;  %v981_v28 = vrot.slane %v980_v26, 1 }
 0x18a   : > { %1487 = vrcp.f32 %v1094_v24  ;;  %v982_v3 = vadd.f32 %v981_v28, %v980_v26 }
 0x18c   : > { %v1486_v16 = vpop.eup %1485 }
 0x18d   : > { %v1140_v1 = vmul.f32 %v1486_v16, %v996_v0 }
 0x194   : > { %v1488_v55 = vpop.eup %1487 }
 0x195   : > { %v1138_v19 = vmul.f32 %v1488_v55, %v982_v3 }
 0x197   : > { %v1175_v29 = vsel %vm1165_vm9, %v1138_v19, %v1174_v38 }
 0x198   : > { %v1176_v8 = vsel %vm1167_vm10, %v1139_v61, %v1175_v29 }
 0x199   : > { %v1177_v4 = vsel %vm1169_vm11, %v1140_v1, %v1176_v8 }
 0x19a   : > { %1181 = vst.msk [vmem:[%s2032_s24 + $0x8] sm:$0xff] %vm692_vm3, %v1177_v4 }
 0x19b   : > { %1504 = shalt.err (!%p1501_p4)
}
 0x19c   : > { %s1505_s7 = scalar_lea.hbm %s2046_s29, 256  ;;  %s1509_s10 = scalar_lea.hbm %s2100_s3, 512 }
 0x19d   : > { %p1506_p7 = scmp.ne.s32.totalorder %s2046_s29, %s1505_s7  ;;  %p1510_p10 = scmp.lt.u32.totalorder %s2046_s29, %s2100_s3 }
 0x19e   : > { %p1511_p11 = scmp.lt.u32.totalorder %s1509_s10, %s1505_s7  ;;  %p1513_p13 = scmp.lt.u32.totalorder %s1505_s7, %s2046_s29 }
 0x19f   : > { %p1507_p8 = pnand %p1506_p7, %p1619_p5 }
 0x1a0   : > { %p1512_p12 = por %p1511_p11, %p1510_p10 }
 0x1a1   : > { %p1508_p9 = pneg %p1507_p8 }
 0x1a2   : > { %p1514_p0 = por %p1513_p13, %p1512_p12 }
 0x1a4   : > { %p1515_p1 = pnand %p1514_p0, %p1508_p9 }
 0x1a6   : > { %1518 = shalt.err (!%p1515_p1)
}
 0x1a7   : > { %s1559_s19 = smov 128   ;;  %s1560_s20 = smov 8  }
 0x1a8   : > { %1361 = dma.vmem_to_hbm [thread:$0]  (%p1619_p5), %s2048_s26, 256, %s2046_s29, %s2056_s16, %s1559_s19, %s1559_s19, %s1560_s20  }
 0x1a9 PF: > { %p1367_p2 = scmp.ge.s32.totalorder %s1553_s15, 2  ;;  %s1211_s24 = sand.u32 1, %s1541_s12  }
 0x1aa   : > { %s1212_s25 = scalar_lea.sflag [#allocation3], %s1211_s24 }
 0x1ab   : > { %p1364_p3 = pnand %p1367_p2, %p1623_p6 }
 0x1ad   : > { %1536 = dma.done.wait (!%p1364_p3), %s1212_s25, 256  }
 0x1ae   : > { %1538 = vsyncadd (!%p1364_p3), %s1212_s25, 4294967040  ;;  %p13_p4 = scmp.ge.s32.totalorder %s1606_s18, 4   ;;  %s2111_s12 = smov %s1545_s13 }
 0x1af   : > { %s2112_s13 = smov %s1549_s14  ;;  %s2113_s14 = smov %s1617_s21 }
 0x1b0   : > { %s2114_s15 = smov %s1606_s18  ;;  %15 = sbr.rel (!%p13_p4) target bundleno = 3 (0x3), region = 70 }
 0x1b7   :  { %1217 = vsyncpa [#allocation3], 1 }
 0x1b8   :  { %1219 = vsyncpa [#allocation3 + $0x1], 1 }

</bundles_post_ra>
